<compile_context>
chip_gen: v7x
topology: tpu7x:2x2x1
jax: 0.10.0
libtpu: 0.0.40
codegen_flags: <defaults>
</compile_context>

<pallas_src>
import functools

import jax
import jax.numpy as jnp
import numpy as np
from jax.experimental import pallas as pl
from jax.experimental.pallas import tpu as pltpu


def pinn_kernel(x_ref, w_in_ref, b_in_ref, w_mid_ref, b_mid_ref,
                w_out_ref, b_out_ref, out_ref, *, matmul_dtype, act_dtype):
    # ---- input layer (dims == 1): (H,1)*(1,T) + (H,1) broadcast on the VPU
    #      (avoids a degenerate K=1 matmul on the MXU).
    x = x_ref[...]                                            # (1, TILE_N) f32
    z = w_in_ref[...] * x + b_in_ref[...]                     # (H, TILE_N) f32
    h = jnp.tanh(z.astype(act_dtype)).astype(matmul_dtype)

    # ---- middle layers: W_l @ h + b_l, tanh.  Static unroll (num_mid small).
    # TODO(synk): for deep nets (num_mid >~ 8) or tile_n >= 2048 switch to
    # lax.fori_loop(..., unroll=True) so live vreg ranges stay bounded.
    num_mid = w_mid_ref.shape[0]
    for l in range(num_mid):
        z = jnp.dot(w_mid_ref[l], h,
                    preferred_element_type=jnp.float32) + b_mid_ref[l]
        h = jnp.tanh(z.astype(act_dtype)).astype(matmul_dtype)  # (H, TILE_N)

    # ---- output layer: (1,H) @ (H,T) + scalar bias (SMEM) -> lane-dense (1,T)
    logits = jnp.dot(w_out_ref[...], h,
                     preferred_element_type=jnp.float32) + b_out_ref[0, 0]
    out_ref[...] = logits.astype(out_ref.dtype)


def pinn_forward(x, params, *, tile_n=None, max_tile_n=4096,
                 matmul_dtype=jnp.bfloat16, act_dtype=jnp.float32):
    """x: (N, 1) or (N,) f32 collocation points.  Returns (N, 1) f32 logits.

    tile_n (multiple of 128) tiles the batch; if None it is auto-chosen so the
    grid has ~2 large tiles (one per v7x TensorCore, cheap on v5e/v6e), capped
    at max_tile_n.  matmul_dtype=bf16 feeds the MXU its native operand type
    (f32 accumulate is kept); act_dtype=bf16 is an opt-in for the v6e/v7x bf16
    EUP — keep f32 on v5e.
    """
    # TODO(synk): dims=2 (cartesian_prod of x, t) and pinning=True multiplier
    # are not implemented (module defaults: dims=1, pinning=False).
    assert params["w_in"].shape[1] == 1, "kernel input layer assumes dims == 1"

    x = jnp.asarray(x, jnp.float32).reshape(-1)
    n = x.shape[0]

    if tile_n is None:
        # Big tiles amortize the ~0.35 us fixed per-grid-step cost; target two
        # tiles so the "parallel" axis feeds both v7x TensorCores.
        tile_n = min(max_tile_n, max(128, 128 * pl.cdiv(pl.cdiv(n, 2), 128)))
    assert tile_n % 128 == 0

    n_pad = tile_n * pl.cdiv(n, tile_n)
    if n_pad != n:
        x = jnp.pad(x, (0, n_pad - n))
    x_t = x.reshape(1, n_pad)                                 # batch on lanes

    dim_h = params["w_in"].shape[0]
    num_mid = params["w_mid"].shape[0]
    num_tiles = n_pad // tile_n

    # Cast MXU operands once in the wrapper: halves the one-time weight DMA and
    # removes the per-grid-step / per-layer astype from the kernel body.
    w_mid = params["w_mid"].astype(matmul_dtype)
    w_out = params["w_out"].astype(matmul_dtype)
    b_out = params["b_out"].astype(jnp.float32).reshape(1, 1)  # SMEM scalar

    def const_spec(shape):
        # Full-array block, constant index_map -> fetched once, stays
        # VMEM-resident across all grid steps (no per-tile re-DMA).
        return pl.BlockSpec(shape, lambda i: (0,) * len(shape))

    grid_spec = pltpu.PrefetchScalarGridSpec(
        num_scalar_prefetch=0,
        grid=(num_tiles,),
        in_specs=[
            pl.BlockSpec((1, tile_n), lambda i: (0, i)),      # x tile (lanes)
            const_spec((dim_h, 1)),                           # w_in   (f32)
            const_spec((dim_h, 1)),                           # b_in   (f32)
            const_spec((num_mid, dim_h, dim_h)),              # w_mid  (matmul dt)
            const_spec((num_mid, dim_h, 1)),                  # b_mid  (f32)
            const_spec((1, dim_h)),                           # w_out  (matmul dt)
            pl.BlockSpec(memory_space=pltpu.MemorySpace.SMEM),  # b_out scalar
        ],
        out_specs=pl.BlockSpec((1, tile_n), lambda i: (0, i)),  # lane-dense out
    )

    out_t = pl.pallas_call(
        functools.partial(pinn_kernel, matmul_dtype=matmul_dtype,
                          act_dtype=act_dtype),
        out_shape=jax.ShapeDtypeStruct((1, n_pad), jnp.float32),
        grid_spec=grid_spec,
        compiler_params=pltpu.CompilerParams(
            dimension_semantics=("parallel",)),   # tiles shard across TCs (v7x)
    )(x_t, params["w_in"], params["b_in"], w_mid, params["b_mid"],
      w_out, b_out)

    return out_t.reshape(n_pad, 1)[:n]


def init_params(key, num_hidden, dim_hidden, dims=1, dim_layer_out=1):
    """nn.Linear-style U(-1/sqrt(fan_in), 1/sqrt(fan_in)) init, PyTorch
    (out_features, in_features) weight layout so the kernel left-multiplies."""
    num_mid = num_hidden - 1
    ks = jax.random.split(key, 6)

    def unif(k, shape, fan_in):
        bound = 1.0 / np.sqrt(fan_in)
        return jax.random.uniform(k, shape, jnp.float32, -bound, bound)

    return {
        "w_in":  unif(ks[0], (dim_hidden, dims), dims),                  # (H, 1)
        "b_in":  unif(ks[1], (dim_hidden, 1), dims),                     # (H, 1)
        "w_mid": unif(ks[2], (num_mid, dim_hidden, dim_hidden),
                      dim_hidden),                                       # (L, H, H)
        "b_mid": unif(ks[3], (num_mid, dim_hidden, 1), dim_hidden),      # (L, H, 1)
        "w_out": unif(ks[4], (dim_layer_out, dim_hidden), dim_hidden),   # (1, H)
        "b_out": unif(ks[5], (dim_layer_out, 1), dim_hidden),            # (1, 1)
    }


def pinn_reference(x, params):
    """Plain-JAX reference (batch-major layout), matmuls pinned to HIGHEST."""
    hi = jax.lax.Precision.HIGHEST
    x = jnp.asarray(x, jnp.float32).reshape(-1, 1)               # (N, 1)
    h = jnp.tanh(x * params["w_in"].T + params["b_in"].T)        # (N, H), dims=1
    for l in range(params["w_mid"].shape[0]):
        h = jnp.tanh(jnp.dot(h, params["w_mid"][l].T, precision=hi)
                     + params["b_mid"][l].T)
    return jnp.dot(h, params["w_out"].T, precision=hi) + params["b_out"].T


if __name__ == "__main__":
    # Shapes consistent with the module: dims=1, dim_hidden=32, num_hidden=3
    # (-> 2 middle layers).  1024 collocation points -> two parallel 512-wide
    # tiles (one per v7x TensorCore; trivial 2-step loop on v5e/v6e).
    NUM_HIDDEN = 3
    DIM_HIDDEN = 32
    N = 1024

    key = jax.random.PRNGKey(0)
    k_x, k_p = jax.random.split(key)
    x = jax.random.uniform(k_x, (N, 1), jnp.float32)   # collocation points
    params = init_params(k_p, NUM_HIDDEN, DIM_HIDDEN)

    ref = pinn_reference(x, params)

    # Default path: bf16 MXU operands, f32 accumulate, f32 tanh/bias.
    out = jax.block_until_ready(pinn_forward(x, params))
    np.testing.assert_allclose(np.asarray(out), np.asarray(ref),
                               rtol=5e-2, atol=5e-2)

    # f32-operand MXU path (multi-pass emulated): tight check vs HIGHEST ref.
    out_f32 = jax.block_until_ready(
        pinn_forward(x, params, matmul_dtype=jnp.float32))
    np.testing.assert_allclose(np.asarray(out_f32), np.asarray(ref),
                               rtol=1e-5, atol=1e-5)

    # act_dtype=jnp.bfloat16 is available for v6e/v7x (bf16 EUP ~2x tanh
    # throughput); not exercised here so the default demo stays v5e-safe and
    # precision-conservative.
    print("KERNEL_OK")
</pallas_src>

<mosaic_0001>
module attributes {stable_mosaic.version = 11 : i64} {
  func.func @pinn_kernel(%arg0: i32, %arg1: memref<1x512xf32, #tpu.memory_space<vmem>>, %arg2: memref<32x1xf32, #tpu.memory_space<vmem>>, %arg3: memref<32x1xf32, #tpu.memory_space<vmem>>, %arg4: memref<2x32x32xbf16, #tpu.memory_space<vmem>>, %arg5: memref<2x32x1xf32, #tpu.memory_space<vmem>>, %arg6: memref<1x32xbf16, #tpu.memory_space<vmem>>, %arg7: memref<1x1xf32, #tpu.memory_space<smem>>, %arg8: memref<1x512xf32, #tpu.memory_space<vmem>>) attributes {dimension_semantics = [#tpu.dimension_semantics<parallel>], iteration_bounds = array<i64: 2>, scalar_prefetch = 0 : i64, scratch_operands = 0 : i64, tpu.core_type = #tpu.core_type<tc>, window_params = [{transform_indices = @transform_0, window_bounds = array<i64: 1, 512>}, {pipeline_mode = #tpu.pipeline_mode<synchronous>, transform_indices = @transform_1, window_bounds = array<i64: 32, 1>}, {pipeline_mode = #tpu.pipeline_mode<synchronous>, transform_indices = @transform_2, window_bounds = array<i64: 32, 1>}, {pipeline_mode = #tpu.pipeline_mode<synchronous>, transform_indices = @transform_3, window_bounds = array<i64: 2, 32, 32>}, {pipeline_mode = #tpu.pipeline_mode<synchronous>, transform_indices = @transform_4, window_bounds = array<i64: 2, 32, 1>}, {pipeline_mode = #tpu.pipeline_mode<synchronous>, transform_indices = @transform_5, window_bounds = array<i64: 1, 32>}, {transform_indices = @transform_6, window_bounds = array<i64: 1, 1>}, {transform_indices = @transform_7, window_bounds = array<i64: 1, 512>}]} {
    %c0 = arith.constant 0 : index
    %c0_0 = arith.constant 0 : index
    %0 = vector.load %arg1[%c0, %c0_0] : memref<1x512xf32, #tpu.memory_space<vmem>>, vector<1x512xf32>
    %c0_1 = arith.constant 0 : index
    %c0_2 = arith.constant 0 : index
    %1 = vector.load %arg2[%c0_1, %c0_2] : memref<32x1xf32, #tpu.memory_space<vmem>>, vector<32x1xf32>
    %2 = vector.broadcast %1 : vector<32x1xf32> to vector<32x512xf32>
    %3 = vector.broadcast %0 : vector<1x512xf32> to vector<32x512xf32>
    %4 = arith.mulf %2, %3 : vector<32x512xf32>
    %c0_3 = arith.constant 0 : index
    %c0_4 = arith.constant 0 : index
    %5 = vector.load %arg3[%c0_3, %c0_4] : memref<32x1xf32, #tpu.memory_space<vmem>>, vector<32x1xf32>
    %6 = vector.broadcast %5 : vector<32x1xf32> to vector<32x512xf32>
    %7 = arith.addf %4, %6 : vector<32x512xf32>
    %8 = math.tanh %7 : vector<32x512xf32>
    %9 = arith.truncf %8 : vector<32x512xf32> to vector<32x512xbf16>
    %c0_5 = arith.constant 0 : index
    %c0_6 = arith.constant 0 : index
    %c0_7 = arith.constant 0 : index
    %10 = vector.load %arg4[%c0_5, %c0_6, %c0_7] : memref<2x32x32xbf16, #tpu.memory_space<vmem>>, vector<1x32x32xbf16>
    %11 = vector.shape_cast %10 : vector<1x32x32xbf16> to vector<32x32xbf16>
    %cst = arith.constant dense<0.000000e+00> : vector<32x512xf32>
    %12 = tpu.matmul %11, %9, %cst {dimension_numbers = #tpu.dot_dimension_numbers<[1], [0], [0], [1], [0, 0, 1, 1], [], []>} : vector<32x32xbf16>, vector<32x512xbf16>, vector<32x512xf32> -> vector<32x512xf32>
    %c0_8 = arith.constant 0 : index
    %c0_9 = arith.constant 0 : index
    %c0_10 = arith.constant 0 : index
    %13 = vector.load %arg5[%c0_8, %c0_9, %c0_10] : memref<2x32x1xf32, #tpu.memory_space<vmem>>, vector<1x32x1xf32>
    %14 = vector.shape_cast %13 : vector<1x32x1xf32> to vector<32x1xf32>
    %15 = vector.broadcast %14 : vector<32x1xf32> to vector<32x512xf32>
    %16 = arith.addf %12, %15 : vector<32x512xf32>
    %17 = math.tanh %16 : vector<32x512xf32>
    %18 = arith.truncf %17 : vector<32x512xf32> to vector<32x512xbf16>
    %c1 = arith.constant 1 : index
    %c0_11 = arith.constant 0 : index
    %c0_12 = arith.constant 0 : index
    %19 = vector.load %arg4[%c1, %c0_11, %c0_12] : memref<2x32x32xbf16, #tpu.memory_space<vmem>>, vector<1x32x32xbf16>
    %20 = vector.shape_cast %19 : vector<1x32x32xbf16> to vector<32x32xbf16>
    %cst_13 = arith.constant dense<0.000000e+00> : vector<32x512xf32>
    %21 = tpu.matmul %20, %18, %cst_13 {dimension_numbers = #tpu.dot_dimension_numbers<[1], [0], [0], [1], [0, 0, 1, 1], [], []>} : vector<32x32xbf16>, vector<32x512xbf16>, vector<32x512xf32> -> vector<32x512xf32>
    %c1_14 = arith.constant 1 : index
    %c0_15 = arith.constant 0 : index
    %c0_16 = arith.constant 0 : index
    %22 = vector.load %arg5[%c1_14, %c0_15, %c0_16] : memref<2x32x1xf32, #tpu.memory_space<vmem>>, vector<1x32x1xf32>
    %23 = vector.shape_cast %22 : vector<1x32x1xf32> to vector<32x1xf32>
    %24 = vector.broadcast %23 : vector<32x1xf32> to vector<32x512xf32>
    %25 = arith.addf %21, %24 : vector<32x512xf32>
    %26 = math.tanh %25 : vector<32x512xf32>
    %27 = arith.truncf %26 : vector<32x512xf32> to vector<32x512xbf16>
    %c0_17 = arith.constant 0 : index
    %c0_18 = arith.constant 0 : index
    %28 = vector.load %arg6[%c0_17, %c0_18] : memref<1x32xbf16, #tpu.memory_space<vmem>>, vector<1x32xbf16>
    %cst_19 = arith.constant dense<0.000000e+00> : vector<1x512xf32>
    %29 = tpu.matmul %28, %27, %cst_19 {dimension_numbers = #tpu.dot_dimension_numbers<[1], [0], [0], [1], [0, 0, 1, 1], [], []>} : vector<1x32xbf16>, vector<32x512xbf16>, vector<1x512xf32> -> vector<1x512xf32>
    %c0_20 = arith.constant 0 : index
    %c0_21 = arith.constant 0 : index
    %30 = memref.load %arg7[%c0_20, %c0_21] : memref<1x1xf32, #tpu.memory_space<smem>>
    %31 = vector.broadcast %30 : f32 to vector<1x512xf32>
    %32 = arith.addf %29, %31 : vector<1x512xf32>
    %c0_22 = arith.constant 0 : index
    %c0_23 = arith.constant 0 : index
    %33 = vector.load %arg8[%c0_22, %c0_23] : memref<1x512xf32, #tpu.memory_space<vmem>>, vector<1x512xf32>
    tpu.vector_store %arg8[%c0_22, %c0_23], %32 {strides = array<i32>} : memref<1x512xf32, #tpu.memory_space<vmem>>, vector<1x512xf32>,
    return
  }
  func.func @transform_0(%arg0: i32) -> (i32, i32) {
    %c0_i32 = arith.constant 0 : i32
    %c0_i32_0 = arith.constant 0 : i32
    return %c0_i32, %arg0 : i32, i32
  }
  func.func @transform_1(%arg0: i32) -> (i32, i32) {
    %c0_i32 = arith.constant 0 : i32
    %c0_i32_0 = arith.constant 0 : i32
    %c0_i32_1 = arith.constant 0 : i32
    return %c0_i32, %c0_i32_0 : i32, i32
  }
  func.func @transform_2(%arg0: i32) -> (i32, i32) {
    %c0_i32 = arith.constant 0 : i32
    %c0_i32_0 = arith.constant 0 : i32
    %c0_i32_1 = arith.constant 0 : i32
    return %c0_i32, %c0_i32_0 : i32, i32
  }
  func.func @transform_3(%arg0: i32) -> (i32, i32, i32) {
    %c0_i32 = arith.constant 0 : i32
    %c0_i32_0 = arith.constant 0 : i32
    %c0_i32_1 = arith.constant 0 : i32
    %c0_i32_2 = arith.constant 0 : i32
    return %c0_i32, %c0_i32_0, %c0_i32_1 : i32, i32, i32
  }
  func.func @transform_4(%arg0: i32) -> (i32, i32, i32) {
    %c0_i32 = arith.constant 0 : i32
    %c0_i32_0 = arith.constant 0 : i32
    %c0_i32_1 = arith.constant 0 : i32
    %c0_i32_2 = arith.constant 0 : i32
    return %c0_i32, %c0_i32_0, %c0_i32_1 : i32, i32, i32
  }
  func.func @transform_5(%arg0: i32) -> (i32, i32) {
    %c0_i32 = arith.constant 0 : i32
    %c0_i32_0 = arith.constant 0 : i32
    %c0_i32_1 = arith.constant 0 : i32
    return %c0_i32, %c0_i32_0 : i32, i32
  }
  func.func @transform_6(%arg0: i32) -> (i32, i32) {
    %c0_i32 = arith.constant 0 : i32
    %c0_i32_0 = arith.constant 0 : i32
    %c0_i32_1 = arith.constant 0 : i32
    return %c0_i32, %c0_i32_0 : i32, i32
  }
  func.func @transform_7(%arg0: i32) -> (i32, i32) {
    %c0_i32 = arith.constant 0 : i32
    %c0_i32_0 = arith.constant 0 : i32
    return %c0_i32, %arg0 : i32, i32
  }
}

</mosaic_0001>

<bundles_post_ra>
// kernel: tpu_custom_call.1
= control target key start
LH: loop header
LB: loop body
LE: loop exit
PB: predicated region body
PF: predicated region fallthrough
CT: control target
= control target key end

     0   :  { %s1429_s0 = inlined_call_operand.vmem [shape: f32[1,1024], index: 0, kind: input, shape index: {}]   ;;  %s1430_s1 = inlined_call_operand.vmem [shape: f32[32,1], index: 1, kind: input, shape index: {}]   ;;  %s1431_s2 = inlined_call_operand.vmem [shape: f32[32,1], index: 2, kind: input, shape index: {}]   ;;  %s1432_s3 = inlined_call_operand.vmem [shape: bf16[2,32,32], index: 3, kind: input, shape index: {}]   ;;  %s1433_s4 = inlined_call_operand.vmem [shape: f32[2,32,1], index: 4, kind: input, shape index: {}]   ;;  %s1434_s5 = inlined_call_operand.vmem [shape: bf16[1,32], index: 5, kind: input, shape index: {}]   ;;  %s1435_s6 = inlined_call_operand.<no memory space> [shape: f32[1,1], index: 6, kind: input, shape index: {}]   ;;  %s1436_s7 = inlined_call_operand.hbm [shape: f32[1,1024], index: 7, kind: output, shape index: {}]  }
   0x1   :  { %12 = sst [smem:[#allocation2]] %s1435_s6 }
   0x2   :  { %13 = vsyncpa [#allocation4], 0 }
   0x3   :  { %15 = vsyncpa [#allocation4 + $0x1], 0  ;;  %s1236_s26 = smov 0   ;;  %s1238_s27 = smov 0  }
   0x4   :  { %s1240_s28 = smov 0   ;;  %s1242_s29 = smov 0  }
   0x5 LB: > { %s1257_s6 = sadd.s32 4294967295, %s1188_s29   ;;  %s949_s30 = sadd.s32 4294967294, %s1188_s29   ;;  %s1188_s29 = sphi %s1242_s29, %s1442_s29   ;;  %s1184_s28 = sphi %s1240_s28, %s1441_s28   ;;  %s1180_s27 = sphi %s1238_s27, %s1440_s27   ;;  %s1176_s26 = sphi %s1236_s26, %s1439_s26  }
   0x6   : > { %s1261_s8 = sadd.s32 1, %s1188_s29   ;;  %s180_s9 = sadd.s32 1, %s1184_s28 }
   0x7   : > { %s177_s10 = ssub.s32 %s1188_s29, %s1261_s8  ;;  %p190_p0 = scmp.ne.s32.totalorder %s1184_s28, %s1180_s27 }
   0x8   : > { %p178_p1 = scmp.eq.s32.totalorder %s177_s10, 0  ;;  %p191_p2 = scmp.eq.s32.totalorder %s1257_s6, 1 }
   0x9   : > { %p196_p3 = scmp.ne.s32.totalorder %s1180_s27, %s1176_s26  ;;  %p197_p4 = scmp.eq.s32.totalorder %s949_s30, 1 }
   0xa   : > { %s1272_s11 = scalar_select %p178_p1, %s1184_s28, %s180_s9  }
   0xb   : > { %p1274_p5 = por %p191_p2, %p190_p0  ;;  %p1278_p6 = por %p197_p4, %p196_p3 }
   0xc   : > { %p952_p7 = scmp.ge.s32.totalorder %s1188_s29, 1  ;;  %p241_p8 = scmp.lt.s32.totalorder %s1188_s29, 3 }
   0xe   : > { %p242_p9 = pnand %p952_p7, %p241_p8 }
   0xf   : > { %v341_v0 = vld [vmem:[%s1431_s2] sm:$0xff] (!%p242_p9)  ;;  %v1190_v2 = vmov (!%p242_p9), 0   ;;  %v342_v3 = vld [vmem:[%s1431_s2 + $0x8] sm:$0xff] (!%p242_p9)  ;;  %v283_v5 = vld [vmem:[%s1430_s1 + $0x18] sm:$0xff] (!%p242_p9)  ;;  %s954_s16 = sshll.u32 (!%p242_p9), %s1257_s6, 2  ;;  %v305_v17 = vlaneseq (!%p242_p9)  ;;  %vm443_vm0 = vcmask (!%p242_p9), 261120  }
  0x10   : > { %245 = sbr.rel (%p242_p9) target bundleno = 909 (0x38d), region = 48  ;;  %v280_v1 = vld [vmem:[%s1430_s1] sm:$0xff] (!%p242_p9)  ;;  %1025 = vset.pattern.permute.xlu1 (!%p242_p9), %v1190_v2  ;;  %1024 = vset.pattern.permute.xlu0 (!%p242_p9), %v1190_v2  ;;  %v281_v4 = vld [vmem:[%s1430_s1 + $0x8] sm:$0xff] (!%p242_p9)  ;;  %v282_v6 = vld [vmem:[%s1430_s1 + $0x10] sm:$0xff] (!%p242_p9)  ;;  %p273_p10 = scmp.lt.s32.totalorder (!%p242_p9), %s954_s16, 7 }
  0x11   : > { %347 = vperm.xlu1 (!%p242_p9), %1025, %v341_v0   ;;  %286 = vperm.xlu0 (!%p242_p9), %1024, %v280_v1   ;;  %v344_v7 = vld [vmem:[%s1431_s2 + $0x18] sm:$0xff] (!%p242_p9)  ;;  %v343_v8 = vld [vmem:[%s1431_s2 + $0x10] sm:$0xff] (!%p242_p9)  ;;  %v410_v9 = vld [vmem:[%s1433_s4 + $0x8] sm:$0xff] (!%p242_p9)  ;;  %v1338_v18 = vshrl.u32 (!%p242_p9), %v305_v17, 7  ;;  %s757_s15 = sld [smem:[#allocation2]] (!%p242_p9)  ;;  %s982_s18 = sshll.u32 (!%p242_p9), %s1257_s6, 6 }
  0x12   : > { %482 = vmatprep.mubr.bf16.mxu0 (!%p242_p9), %v1190_v2  ;;  %535 = vmatprep.mubr.bf16.mxu1 (!%p242_p9), %v1190_v2  ;;  %v409_v10 = vld [vmem:[%s1433_s4] sm:$0xff] (!%p242_p9)  ;;  %v412_v11 = vld [vmem:[%s1433_s4 + $0x18] sm:$0xff] (!%p242_p9)  ;;  %v411_v12 = vld [vmem:[%s1433_s4 + $0x10] sm:$0xff] (!%p242_p9)  ;;  %vm875_vm1 = vcmp.lt.s32.totalorder (!%p242_p9), %v305_v17, 512  ;;  %s1387_s23 = scalar_lea.hbm (!%p242_p9), %s1436_s7, %s982_s18  ;;  %s1192_s6 = smov (!%p242_p9), [#allocation3]  }
  0x13   : > { %v966_v13 = vld [vmem:[%s1433_s4 + $0x28] sm:$0xff] (!%p242_p9)  ;;  %v965_v14 = vld [vmem:[%s1433_s4 + $0x20] sm:$0xff] (!%p242_p9)  ;;  %v968_v15 = vld [vmem:[%s1433_s4 + $0x38] sm:$0xff] (!%p242_p9)  ;;  %v307_v19 = vsub.s32 (!%p242_p9), 0, %v1338_v18  ;;  %v311_v20 = vsub.s32 (!%p242_p9), 1, %v1338_v18  ;;  %v315_v21 = vsub.s32 (!%p242_p9), 2, %v1338_v18 }
  0x14   : > { %v967_v16 = vld [vmem:[%s1433_s4 + $0x30] sm:$0xff] (!%p242_p9)  ;;  %v319_v22 = vsub.s32 (!%p242_p9), 3, %v1338_v18  ;;  %s1130_s30 = sshll.u32 (!%p242_p9), %s1192_s6, 4  ;;  %s1131_s30 = int_to_ptr.vmem [resolvable:$false] %s1130_s30 }
  0x15   : > { %352 = vperm.xlu1 (!%p242_p9), %1025, %v342_v3   ;;  %291 = vperm.xlu0 (!%p242_p9), %1024, %v281_v4   ;;  %s1132_s9 = scalar_lea.vmem (!%p242_p9), %s1131_s30, 128 }
  0x17   : > { %s1444_s16 = smov (!%p273_p10, %s954_s16), 7 }
  0x18   : > { %s275_s19 = scalar_lea.vmem %s1429_s0, %s1444_s16  ;;  %s269_s16 = sand.u32 1, %s1180_s27  }
  0x19   : > { %301 = vperm.xlu1 %1025, %v283_v5   ;;  %296 = vperm.xlu0 %1024, %v282_v6   ;;  %v279_v23 = vld [vmem:[%s275_s19] sm:$0xf]  ;;  %s953_s17 = sshll.u32 %s269_s16, 2  ;;  %s879_s24 = scalar_lea.sflag [#allocation4], %s269_s16 }
  0x1a   : > { %v308_v24 = vrot.slane %v279_v23, %v307_v19  ;;  %v312_v25 = vrot.slane %v279_v23, %v311_v20  ;;  %v316_v26 = vrot.slane %v279_v23, %v315_v21  ;;  %v320_v27 = vrot.slane %v279_v23, %v319_v22  ;;  %s271_s19 = scalar_lea.vmem [#allocation3], %s953_s17 }
  0x1b   : > { %s893_s20 = sshll.u32 %s271_s19, 4  ;;  %s1389_s20 = int_to_ptr.vmem [resolvable:$true] %s893_s20 }
  0x1c   : > { %s1126_s25 = scalar_lea.vmem %s1389_s20, 64  ;;  %p1133_p0 = scmp.lt.s32.totalorder %s1389_s20, %s1131_s30 }
  0x1d   : > { %362 = vperm.xlu1 %1025, %v344_v7   ;;  %357 = vperm.xlu0 %1024, %v343_v8   ;;  %p1127_p11 = scmp.ne.s32.totalorder %s1389_s20, %s1126_s25  ;;  %p1134_p1 = scmp.lt.s32.totalorder %s1132_s9, %s1126_s25 }
  0x1f   : > { %p1128_p12 = pnand %p1127_p11, %p1274_p5  ;;  %p1135_p2 = por %p1134_p1, %p1133_p0 }
  0x21   : > { %420 = vperm.xlu1 %1025, %v410_v9   ;;  %415 = vperm.xlu0 %1024, %v409_v10   ;;  %p1129_p13 = pneg %p1128_p12 }
  0x23   : > { %p1136_p3 = pnand %p1135_p2, %p1129_p13 }
  0x25   : > { %430 = vperm.xlu1 %1025, %v412_v11   ;;  %425 = vperm.xlu0 %1024, %v411_v12  }
  0x29   : > { %597 = vperm.xlu1 %1025, %v966_v13   ;;  %592 = vperm.xlu0 %1024, %v965_v14  }
  0x2d   : > { %607 = vperm.xlu1 %1025, %v968_v15   ;;  %602 = vperm.xlu0 %1024, %v967_v16  }
  0x90   : > { %v348_v28 = vpop.permute.xlu1 %347  ;;  %v287_v29 = vpop.permute.xlu0 %286 }
  0x91   : > { %v325_v30 = vmul.f32 %v308_v24, %v287_v29  ;;  %v326_v31 = vmul.f32 %v312_v25, %v287_v29  ;;  %v327_v32 = vmul.f32 %v316_v26, %v287_v29  ;;  %v328_v33 = vmul.f32 %v320_v27, %v287_v29 }
  0x93   : > { %v365_v34 = vadd.f32 %v348_v28, %v325_v30  ;;  %v366_v35 = vadd.f32 %v348_v28, %v326_v31  ;;  %v367_v36 = vadd.f32 %v348_v28, %v327_v32  ;;  %v368_v37 = vadd.f32 %v348_v28, %v328_v33  ;;  %v1026_v31 = vld [vmem:[%s1432_s3] sm:$0xff]   ;;  %v1027_v32 = vld [vmem:[%s1432_s3 + $0x8] sm:$0xff]  }
  0x94   : > { %v353_v38 = vpop.permute.xlu1 %352  ;;  %v292_v39 = vpop.permute.xlu0 %291 }
  0x95   : > { %1030 = vtanh.f32 %v365_v34  ;;  %v329_v40 = vmul.f32 %v308_v24, %v292_v39  ;;  %v330_v41 = vmul.f32 %v312_v25, %v292_v39  ;;  %v331_v42 = vmul.f32 %v316_v26, %v292_v39 }
  0x96   : > { %1032 = vtanh.f32 %v366_v35  ;;  %v332_v43 = vmul.f32 %v320_v27, %v292_v39 }
  0x97   : > { %1034 = vtanh.f32 %v367_v36  ;;  %v369_v44 = vadd.f32 %v353_v38, %v329_v40  ;;  %v370_v45 = vadd.f32 %v353_v38, %v330_v41  ;;  %v371_v46 = vadd.f32 %v353_v38, %v331_v42 }
  0x98   : > { %1036 = vtanh.f32 %v368_v37  ;;  %v372_v47 = vadd.f32 %v353_v38, %v332_v43  ;;  %v302_v48 = vpop.permute.xlu1 %301  ;;  %v297_v49 = vpop.permute.xlu0 %296 }
  0x99   : > { %1038 = vtanh.f32 %v369_v44  ;;  %v337_v50 = vmul.f32 %v308_v24, %v302_v48  ;;  %v338_v51 = vmul.f32 %v312_v25, %v302_v48  ;;  %v339_v52 = vmul.f32 %v316_v26, %v302_v48 }
  0x9a   : > { %1040 = vtanh.f32 %v370_v45  ;;  %v340_v53 = vmul.f32 %v320_v27, %v302_v48  ;;  %v333_v56 = vmul.f32 %v308_v24, %v297_v49  ;;  %v334_v60 = vmul.f32 %v312_v25, %v297_v49 }
  0x9b   : > { %1042 = vtanh.f32 %v371_v46  ;;  %v335_v63 = vmul.f32 %v316_v26, %v297_v49  ;;  %v336_v3 = vmul.f32 %v320_v27, %v297_v49 }
  0x9c   : > { %1044 = vtanh.f32 %v372_v47  ;;  %v363_v54 = vpop.permute.xlu1 %362  ;;  %v358_v55 = vpop.permute.xlu0 %357 }
  0x9d   : > { %v377_v57 = vadd.f32 %v363_v54, %v337_v50  ;;  %v378_v58 = vadd.f32 %v363_v54, %v338_v51  ;;  %v379_v59 = vadd.f32 %v363_v54, %v339_v52  ;;  %v380_v61 = vadd.f32 %v363_v54, %v340_v53 }
  0x9e   : > { %v373_v0 = vadd.f32 %v358_v55, %v333_v56  ;;  %v374_v4 = vadd.f32 %v358_v55, %v334_v60  ;;  %v375_v6 = vadd.f32 %v358_v55, %v335_v63  ;;  %v376_v8 = vadd.f32 %v358_v55, %v336_v3 }
  0x9f   : > { %v1031_v62 = vpop.eup %1030  ;;  %1046 = vtanh.f32 %v377_v57 }
  0xa0   : > { %v1033_v1 = vpop.eup %1032  ;;  %1048 = vtanh.f32 %v378_v58  ;;  %v416_v33 = vpop.permute.xlu0 %415 }
  0xa1   : > { %v1035_v5 = vpop.eup %1034  ;;  %1050 = vtanh.f32 %v379_v59  ;;  %v421_v35 = vpop.permute.xlu1 %420 }
  0xa2   : > { %v1037_v7 = vpop.eup %1036  ;;  %1052 = vtanh.f32 %v380_v61 }
  0xa3   : > { %v1039_v9 = vpop.eup %1038  ;;  %1054 = vtanh.f32 %v373_v0 }
  0xa4   : > { %v1041_v10 = vpop.eup %1040  ;;  %1056 = vtanh.f32 %v374_v4  ;;  %v397_v11 = vpack.c.bf16 %v1039_v9, %v1031_v62  ;;  %v426_v51 = vpop.permute.xlu0 %425 }
  0xa5   : > { %v1043_v12 = vpop.eup %1042  ;;  %1058 = vtanh.f32 %v375_v6  ;;  %v398_v13 = vpack.c.bf16 %v1041_v10, %v1033_v1  ;;  %v431_v53 = vpop.permute.xlu1 %430 }
  0xa6   : > { %v1045_v14 = vpop.eup %1044  ;;  %1060 = vtanh.f32 %v376_v8  ;;  %v399_v15 = vpack.c.bf16 %v1043_v12, %v1035_v5 }
  0xa7   : > { %450 = vmatprep.subr.bf16.mxu0 %v398_v13  ;;  %v400_v16 = vpack.c.bf16 %v1045_v14, %v1037_v7 }
  0xa8   : > { %451 = vmatpush1.bf16.msra.mxu0 %v397_v11 }
  0xa9   : > { %v1047_v19 = vpop.eup %1046  ;;  %503 = vmatprep.subr.bf16.mxu1 %v400_v16 }
  0xaa   : > { %v1049_v20 = vpop.eup %1048  ;;  %504 = vmatpush1.bf16.msra.mxu1 %v399_v15 }
  0xab   : > { %v1051_v21 = vpop.eup %1050 }
  0xac   : > { %v1053_v22 = vpop.eup %1052 }
  0xad   : > { %v1055_v23 = vpop.eup %1054 }
  0xae   : > { %v1057_v24 = vpop.eup %1056  ;;  %v401_v25 = vpack.c.bf16 %v1047_v19, %v1055_v23 }
  0xaf   : > { %v1059_v26 = vpop.eup %1058  ;;  %v402_v27 = vpack.c.bf16 %v1049_v20, %v1057_v24 }
  0xb0   : > { %v1061_v28 = vpop.eup %1060  ;;  %v403_v29 = vpack.c.bf16 %v1051_v21, %v1059_v26 }
  0xb1   : > { %452 = vmatprep.subr.bf16.mxu0 %v402_v27  ;;  %v404_v30 = vpack.c.bf16 %v1053_v22, %v1061_v28 }
  0xb2   : > { %453 = vmatpush1.bf16.msra.mxu0 %v401_v25 }
  0xb3   : > { %505 = vmatprep.subr.bf16.mxu1 %v404_v30 }
  0xb4   : > { %506 = vmatpush1.bf16.msra.mxu1 %v403_v29 }
  0xb5   : > { %957 = vmatmul.mubr.msk.bf16.vlgmr.msra.gmra.mrb[0].mxu0 %vm443_vm0, %v1026_v31 }
  0xb6   : > { %492 = vmatprep.mubr.bf16.mxu0 %v1190_v2 }
  0xb7   : > { %959 = vmatmul.mubr.msk.bf16.vlgmr.msra.gmra.mrb[0].mxu1 %vm443_vm0, %v1026_v31 }
  0xb8   : > { %545 = vmatprep.mubr.bf16.mxu1 %v1190_v2 }
  0xbd   : > { %958 = vmatmul.mubr.msk.bf16.gmra.mrb[4].mxu0 %vm443_vm0, %v1027_v32 }
  0xbe   : > { %658 = vmatprep.mubr.bf16.mxu0 %v1190_v2 }
  0xbf   : > { %960 = vmatmul.mubr.msk.bf16.gmra.mrb[4].mxu1 %vm443_vm0, %v1027_v32  ;;  %v1028_v32 = vld [vmem:[%s1432_s3 + $0x10] sm:$0xff]  }
  0xc0   : > { %711 = vmatprep.mubr.bf16.mxu1 %v1190_v2 }
 0x188   : > { %v484_v34 = vpop.f32.mrb[0].mxu0 }
 0x189   : > { %v485_v36 = vadd.f32 %v484_v34, %v416_v33  ;;  %v486_v37 = vpop.f32.mrb[1].mxu0  ;;  %v598_v34 = vpop.permute.xlu1 %597 }
 0x18a   : > { %v537_v38 = vpop.f32.mrb[0].mxu1  ;;  %v487_v39 = vadd.f32 %v486_v37, %v416_v33  ;;  %v488_v40 = vpop.f32.mrb[2].mxu0 }
 0x18b   : > { %1062 = vtanh.f32 %v485_v36  ;;  %v538_v41 = vadd.f32 %v537_v38, %v416_v33  ;;  %v539_v42 = vpop.f32.mrb[1].mxu1  ;;  %v489_v43 = vadd.f32 %v488_v40, %v421_v35  ;;  %v490_v44 = vpop.f32.mrb[3].mxu0 }
 0x18c   : > { %1064 = vtanh.f32 %v487_v39  ;;  %v540_v45 = vadd.f32 %v539_v42, %v416_v33  ;;  %v541_v46 = vpop.f32.mrb[2].mxu1  ;;  %v491_v48 = vadd.f32 %v490_v44, %v421_v35  ;;  %v1029_v33 = vld [vmem:[%s1432_s3 + $0x18] sm:$0xff]  }
 0x18d   : > { %1066 = vtanh.f32 %v538_v41  ;;  %v542_v47 = vadd.f32 %v541_v46, %v421_v35  ;;  %v543_v49 = vpop.f32.mrb[3].mxu1 }
 0x18e   : > { %1068 = vtanh.f32 %v540_v45  ;;  %v544_v50 = vadd.f32 %v543_v49, %v421_v35  ;;  %v593_v35 = vpop.permute.xlu0 %592 }
 0x18f   : > { %1070 = vtanh.f32 %v489_v43 }
 0x190   : > { %1072 = vtanh.f32 %v542_v47  ;;  %v494_v52 = vpop.f32.mrb[4].mxu0 }
 0x191   : > { %1074 = vtanh.f32 %v491_v48  ;;  %v495_v54 = vadd.f32 %v494_v52, %v426_v51  ;;  %v496_v55 = vpop.f32.mrb[5].mxu0 }
 0x192   : > { %1076 = vtanh.f32 %v544_v50  ;;  %v547_v56 = vpop.f32.mrb[4].mxu1  ;;  %v497_v57 = vadd.f32 %v496_v55, %v426_v51  ;;  %v498_v58 = vpop.f32.mrb[6].mxu0 }
 0x193   : > { %1078 = vtanh.f32 %v495_v54  ;;  %v548_v59 = vadd.f32 %v547_v56, %v426_v51  ;;  %v549_v60 = vpop.f32.mrb[5].mxu1  ;;  %v499_v61 = vadd.f32 %v498_v58, %v431_v53  ;;  %v500_v62 = vpop.f32.mrb[7].mxu0 }
 0x194   : > { %1080 = vtanh.f32 %v497_v57  ;;  %v550_v63 = vadd.f32 %v549_v60, %v426_v51  ;;  %v551_v0 = vpop.f32.mrb[6].mxu1  ;;  %v501_v4 = vadd.f32 %v500_v62, %v431_v53  ;;  %v608_v51 = vpop.permute.xlu1 %607 }
 0x195   : > { %v1063_v1 = vpop.eup %1062  ;;  %1082 = vtanh.f32 %v548_v59  ;;  %v552_v3 = vadd.f32 %v551_v0, %v431_v53  ;;  %v553_v5 = vpop.f32.mrb[7].mxu1 }
 0x196   : > { %v1065_v6 = vpop.eup %1064  ;;  %1084 = vtanh.f32 %v550_v63  ;;  %v554_v7 = vadd.f32 %v553_v5, %v431_v53  ;;  %v603_v52 = vpop.permute.xlu0 %602 }
 0x197   : > { %v1067_v8 = vpop.eup %1066  ;;  %1086 = vtanh.f32 %v499_v61 }
 0x198   : > { %v1069_v9 = vpop.eup %1068  ;;  %1088 = vtanh.f32 %v552_v3 }
 0x199   : > { %v1071_v10 = vpop.eup %1070  ;;  %1090 = vtanh.f32 %v501_v4 }
 0x19a   : > { %v1073_v11 = vpop.eup %1072  ;;  %1092 = vtanh.f32 %v554_v7  ;;  %v572_v12 = vpack.c.bf16 %v1071_v10, %v1063_v1 }
 0x19b   : > { %v1075_v13 = vpop.eup %1074  ;;  %v574_v14 = vpack.c.bf16 %v1073_v11, %v1067_v8 }
 0x19c   : > { %v1077_v15 = vpop.eup %1076  ;;  %v573_v16 = vpack.c.bf16 %v1075_v13, %v1065_v6 }
 0x19d   : > { %v1079_v19 = vpop.eup %1078  ;;  %v575_v20 = vpack.c.bf16 %v1077_v15, %v1069_v9 }
 0x19e   : > { %v1081_v21 = vpop.eup %1080  ;;  %626 = vmatprep.subr.bf16.mxu0 %v573_v16 }
 0x19f   : > { %v1083_v22 = vpop.eup %1082  ;;  %679 = vmatprep.subr.bf16.mxu1 %v575_v20  ;;  %627 = vmatpush1.bf16.msra.mxu0 %v572_v12 }
 0x1a0   : > { %v1085_v23 = vpop.eup %1084  ;;  %680 = vmatpush1.bf16.msra.mxu1 %v574_v14 }
 0x1a1   : > { %v1087_v24 = vpop.eup %1086 }
 0x1a2   : > { %v1089_v25 = vpop.eup %1088  ;;  %v576_v26 = vpack.c.bf16 %v1087_v24, %v1079_v19 }
 0x1a3   : > { %v1091_v27 = vpop.eup %1090  ;;  %v578_v28 = vpack.c.bf16 %v1089_v25, %v1083_v22 }
 0x1a4   : > { %v1093_v29 = vpop.eup %1092  ;;  %v577_v30 = vpack.c.bf16 %v1091_v27, %v1081_v21 }
 0x1a5   : > { %v579_v31 = vpack.c.bf16 %v1093_v29, %v1085_v23 }
 0x1a6   : > { %628 = vmatprep.subr.bf16.mxu0 %v577_v30 }
 0x1a7   : > { %681 = vmatprep.subr.bf16.mxu1 %v579_v31  ;;  %629 = vmatpush1.bf16.msra.mxu0 %v576_v26 }
 0x1a8   : > { %682 = vmatpush1.bf16.msra.mxu1 %v578_v28 }
 0x1aa   : > { %971 = vmatmul.mubr.msk.bf16.vlgmr.msra.gmra.mrb[8].mxu0 %vm443_vm0, %v1028_v32 }
 0x1ab   : > { %973 = vmatmul.mubr.msk.bf16.vlgmr.msra.gmra.mrb[8].mxu1 %vm443_vm0, %v1028_v32  ;;  %668 = vmatprep.mubr.bf16.mxu0 %v1190_v2  ;;  %v756_v32 = vld [vmem:[%s1434_s5] sm:$0x1] }
 0x1ac   : > { %721 = vmatprep.mubr.bf16.mxu1 %v1190_v2 }
 0x1b2   : > { %972 = vmatmul.mubr.msk.bf16.gmra.mrb[12].mxu0 %vm443_vm0, %v1029_v33 }
 0x1b3   : > { %974 = vmatmul.mubr.msk.bf16.gmra.mrb[12].mxu1 %vm443_vm0, %v1029_v33  ;;  %794 = vmatprep.mubr.bf16.mxu0 %v1190_v2  ;;  %v1191_v33 = vmov 1966171168  }
 0x1b4   : > { %835 = vmatprep.mubr.bf16.mxu1 %v1190_v2 }
 0x27d   : > { %v660_v36 = vpop.f32.mrb[8].mxu0 }
 0x27e   : > { %v661_v37 = vadd.f32 %v660_v36, %v593_v35  ;;  %v713_v38 = vpop.f32.mrb[8].mxu1  ;;  %v662_v39 = vpop.f32.mrb[9].mxu0 }
 0x27f   : > { %v714_v40 = vadd.f32 %v713_v38, %v593_v35  ;;  %v663_v41 = vadd.f32 %v662_v39, %v593_v35  ;;  %v715_v42 = vpop.f32.mrb[9].mxu1  ;;  %v664_v43 = vpop.f32.mrb[10].mxu0 }
 0x280   : > { %1094 = vtanh.f32 %v661_v37  ;;  %v716_v44 = vadd.f32 %v715_v42, %v593_v35  ;;  %v665_v45 = vadd.f32 %v664_v43, %v598_v34  ;;  %v717_v46 = vpop.f32.mrb[10].mxu1  ;;  %v666_v47 = vpop.f32.mrb[11].mxu0  ;;  %v758_v35 = vstv %s757_s15 }
 0x281   : > { %1096 = vtanh.f32 %v714_v40  ;;  %v718_v48 = vadd.f32 %v717_v46, %v598_v34  ;;  %v719_v49 = vpop.f32.mrb[11].mxu1  ;;  %v667_v2 = vadd.f32 %v666_v47, %v598_v34 }
 0x282   : > { %1098 = vtanh.f32 %v663_v41  ;;  %v720_v50 = vadd.f32 %v719_v49, %v598_v34  ;;  %v851_v34 = vunpack.c.l.s4 %v1191_v33 }
 0x283   : > { %1100 = vtanh.f32 %v716_v44 }
 0x284   : > { %1102 = vtanh.f32 %v665_v45  ;;  %v852_v36 = vunpack.c.0.s8 %v851_v34 }
 0x285   : > { %1104 = vtanh.f32 %v718_v48  ;;  %v670_v53 = vpop.f32.mrb[12].mxu0 }
 0x286   : > { %1106 = vtanh.f32 %v667_v2  ;;  %v671_v54 = vadd.f32 %v670_v53, %v603_v52  ;;  %v723_v55 = vpop.f32.mrb[12].mxu1  ;;  %v672_v56 = vpop.f32.mrb[13].mxu0  ;;  %v855_v43 = vsub.s32 %v852_v36, %v1338_v18 }
 0x287   : > { %1108 = vtanh.f32 %v720_v50  ;;  %v724_v57 = vadd.f32 %v723_v55, %v603_v52  ;;  %v673_v58 = vadd.f32 %v672_v56, %v603_v52  ;;  %v725_v59 = vpop.f32.mrb[13].mxu1  ;;  %v674_v60 = vpop.f32.mrb[14].mxu0 }
 0x288   : > { %1110 = vtanh.f32 %v671_v54  ;;  %v726_v61 = vadd.f32 %v725_v59, %v603_v52  ;;  %v675_v62 = vadd.f32 %v674_v60, %v608_v51  ;;  %v727_v63 = vpop.f32.mrb[14].mxu1  ;;  %v676_v0 = vpop.f32.mrb[15].mxu0 }
 0x289   : > { %1112 = vtanh.f32 %v724_v57  ;;  %v728_v1 = vadd.f32 %v727_v63, %v608_v51  ;;  %v729_v3 = vpop.f32.mrb[15].mxu1  ;;  %v677_v5 = vadd.f32 %v676_v0, %v608_v51 }
 0x28a   : > { %v1095_v4 = vpop.eup %1094  ;;  %1114 = vtanh.f32 %v673_v58  ;;  %v730_v7 = vadd.f32 %v729_v3, %v608_v51 }
 0x28b   : > { %v1097_v6 = vpop.eup %1096  ;;  %1116 = vtanh.f32 %v726_v61 }
 0x28c   : > { %v1099_v8 = vpop.eup %1098  ;;  %1118 = vtanh.f32 %v675_v62 }
 0x28d   : > { %v1101_v9 = vpop.eup %1100  ;;  %1120 = vtanh.f32 %v728_v1 }
 0x28e   : > { %v1103_v10 = vpop.eup %1102  ;;  %1122 = vtanh.f32 %v677_v5 }
 0x28f   : > { %v1105_v11 = vpop.eup %1104  ;;  %1124 = vtanh.f32 %v730_v7  ;;  %v748_v12 = vpack.c.bf16 %v1103_v10, %v1095_v4 }
 0x290   : > { %v1107_v13 = vpop.eup %1106  ;;  %v750_v14 = vpack.c.bf16 %v1105_v11, %v1097_v6 }
 0x291   : > { %v1109_v15 = vpop.eup %1108  ;;  %v749_v16 = vpack.c.bf16 %v1107_v13, %v1099_v8 }
 0x292   : > { %v1111_v19 = vpop.eup %1110  ;;  %v751_v20 = vpack.c.bf16 %v1109_v15, %v1101_v9 }
 0x293   : > { %v1113_v21 = vpop.eup %1112  ;;  %762 = vmatprep.subr.bf16.mxu0 %v749_v16 }
 0x294   : > { %v1115_v22 = vpop.eup %1114  ;;  %803 = vmatprep.subr.bf16.mxu1 %v751_v20  ;;  %763 = vmatpush1.bf16.msra.mxu0 %v748_v12 }
 0x295   : > { %v1117_v23 = vpop.eup %1116  ;;  %804 = vmatpush1.bf16.msra.mxu1 %v750_v14 }
 0x296   : > { %v1119_v24 = vpop.eup %1118 }
 0x297   : > { %v1121_v25 = vpop.eup %1120  ;;  %v752_v26 = vpack.c.bf16 %v1119_v24, %v1111_v19 }
 0x298   : > { %v1123_v27 = vpop.eup %1122  ;;  %v754_v28 = vpack.c.bf16 %v1121_v25, %v1113_v21 }
 0x299   : > { %v1125_v29 = vpop.eup %1124  ;;  %v753_v30 = vpack.c.bf16 %v1123_v27, %v1115_v22 }
 0x29a   : > { %v755_v31 = vpack.c.bf16 %v1125_v29, %v1117_v23 }
 0x29b   : > { %764 = vmatprep.subr.bf16.mxu0 %v753_v30 }
 0x29c   : > { %805 = vmatprep.subr.bf16.mxu1 %v755_v31  ;;  %765 = vmatpush1.bf16.msra.mxu0 %v752_v26 }
 0x29d   : > { %806 = vmatpush1.bf16.msra.mxu1 %v754_v28 }
 0x29f   : > { %975 = vmatmul.mubr.msk.bf16.vlgmr.msra.gmra.mrb[16].mxu0 %vm443_vm0, %v756_v32 }
 0x2a0   : > { %976 = vmatmul.mubr.msk.bf16.vlgmr.msra.gmra.mrb[16].mxu1 %vm443_vm0, %v756_v32 }
 0x372   : > { %v796_v37 = vpop.f32.mrb[16].mxu0 }
 0x373   : > { %v797_v38 = vadd.f32 %v796_v37, %v758_v35  ;;  %v837_v39 = vpop.f32.mrb[16].mxu1  ;;  %v798_v40 = vpop.f32.mrb[17].mxu0 }
 0x374   : > { %v838_v41 = vadd.f32 %v837_v39, %v758_v35  ;;  %v799_v42 = vadd.f32 %v798_v40, %v758_v35  ;;  %v839_v44 = vpop.f32.mrb[17].mxu1  ;;  %v800_v45 = vpop.f32.mrb[18].mxu0 }
 0x375   : > { %v840_v46 = vadd.f32 %v839_v44, %v758_v35  ;;  %v841_v47 = vpop.f32.mrb[18].mxu1  ;;  %v801_v48 = vpop.f32.mrb[19].mxu0 }
 0x376   : > { %v848_v49 = vcombine.low %v797_v38, %v799_v42  ;;  %v842_v2 = vpop.f32.mrb[19].mxu1 }
 0x377   : > { %v849_v50 = vcombine.low %v838_v41, %v840_v46 }
 0x378   : > { %v856_v51 = vrot.slane %v848_v49, %v855_v43 }
 0x379   : > { %v863_v52 = vrot.slane %v849_v50, %v855_v43 }
 0x37b   : > { %v864_v53 = vcombine.low %v856_v51, %v863_v52 }
 0x37d   : > { %v871_v54 = vrot.slane %v864_v53, %v855_v43 }
 0x37f   : > { %877 = vst.msk [vmem:[%s271_s19] sm:$0xf] %vm875_vm1, %v871_v54 }
 0x380   : > { %1139 = shalt.err (!%p1136_p3)
}
 0x381   : > { %s1140_s10 = scalar_lea.hbm %s1387_s23, 64  ;;  %s1144_s16 = scalar_lea.hbm %s1436_s7, 128 }
 0x382   : > { %p1141_p4 = scmp.ne.s32.totalorder %s1387_s23, %s1140_s10  ;;  %p1145_p9 = scmp.lt.u32.totalorder %s1387_s23, %s1436_s7 }
 0x383   : > { %p1146_p10 = scmp.lt.u32.totalorder %s1144_s16, %s1140_s10  ;;  %p1148_p12 = scmp.lt.u32.totalorder %s1140_s10, %s1387_s23 }
 0x384   : > { %p1142_p7 = pnand %p1141_p4, %p1274_p5 }
 0x385   : > { %p1147_p11 = por %p1146_p10, %p1145_p9 }
 0x386   : > { %p1143_p8 = pneg %p1142_p7 }
 0x387   : > { %p1149_p13 = por %p1148_p12, %p1147_p11 }
 0x389   : > { %p1150_p0 = pnand %p1149_p13, %p1143_p8 }
 0x38b   : > { %1153 = shalt.err (!%p1150_p0)
}
 0x38c   : > { %983 = dma.vmem_to_hbm [thread:$0]  (%p1274_p5), %s1389_s20, 64, %s1387_s23, %s879_s24  }
 0x38d PF: > { %p989_p1 = scmp.ge.s32.totalorder %s1188_s29, 2  ;;  %s905_s19 = sand.u32 1, %s1176_s26  }
 0x38e   : > { %s906_s21 = scalar_lea.sflag [#allocation4], %s905_s19 }
 0x38f   : > { %p986_p2 = pnand %p989_p1, %p1278_p6 }
 0x391   : > { %1171 = dma.done.wait (!%p986_p2), %s906_s21, 64  }
 0x392   : > { %1173 = vsyncadd (!%p986_p2), %s906_s21, 4294967232  ;;  %p18_p3 = scmp.ge.s32.totalorder %s1261_s8, 4   ;;  %s1439_s26 = smov %s1180_s27 }
 0x393   : > { %s1440_s27 = smov %s1184_s28  ;;  %s1441_s28 = smov %s1272_s11 }
 0x394   : > { %s1442_s29 = smov %s1261_s8  ;;  %20 = sbr.rel (!%p18_p3) target bundleno = 5 (0x5), region = 85 }
 0x39b   :  { %911 = vsyncpa [#allocation4], 1 }
 0x39c   :  { %913 = vsyncpa [#allocation4 + $0x1], 1 }

</bundles_post_ra>
